<compile_context>
chip_gen: v7x
topology: tpu7x:2x2x1
jax: 0.10.0
libtpu: 0.0.40
codegen_flags: <defaults>
</compile_context>

<pallas_src>
import jax
import jax.numpy as jnp
from jax import lax
from jax.experimental import pallas as pl
from jax.experimental.pallas import tpu as pltpu

_SCALING_MIN = 0.001

# Safe across generations: above every default scoped limit, below v7x's 64 MiB
# physical VMEM.  Apply kernel working set is ~4x block bytes (double-buffered
# in + out), i.e. <= ~24 MiB at the largest (v7x) block size.
_VMEM_LIMIT_BYTES = 48 * 1024 * 1024
_REDUCE_BLOCK_BYTES = 2 * 1024 * 1024  # init path runs once; modest blocks are fine

_APPLY_BLOCK_BYTES = None  # lazily resolved from the device generation


def _apply_block_bytes():
    global _APPLY_BLOCK_BYTES
    if _APPLY_BLOCK_BYTES is not None:
        return _APPLY_BLOCK_BYTES
    kind = ""
    try:
        kind = jax.devices()[0].device_kind.lower()
    except Exception:
        pass
    if "v7" in kind or "tpu7" in kind:
        blk = 6 * 1024 * 1024          # big blocks to amortize per-step overhead
    elif "v6" in kind or "tpu6" in kind:
        blk = 4 * 1024 * 1024
    elif "v5" in kind and ("lite" in kind or "v5e" in kind):
        blk = 2 * 1024 * 1024          # ~0.8 TB/s HBM: 2 MiB already hides overhead
    else:
        blk = 4 * 1024 * 1024
    _APPLY_BLOCK_BYTES = blk
    return blk


def _compiler_params(semantics):
    return pltpu.CompilerParams(
        dimension_semantics=semantics,
        vmem_limit_bytes=_VMEM_LIMIT_BYTES,
    )


def _round_up(x, m):
    return ((x + m - 1) // m) * m


def _round_down(x, m):
    return (x // m) * m


def _pick_tiles(R, L, dtype, block_bytes, min_row_blocks=1):
    """Pick (tr, tl) fixed tiles for a cdiv grid over an (R, L) slab.

    Tiles never exceed the array extent; they are either the full extent
    (always legal) or (sub, 128)-aligned, where sub is the dtype's packed
    sublane factor (8 f32 / 16 bf16 / 32 int8).
    """
    itemsize = jnp.dtype(dtype).itemsize
    sub = max(8, 32 // itemsize)

    max_tr = R if R <= sub else _round_down(R, sub)
    max_tl = L if L <= 128 else _round_down(L, 128)

    # Row tile: modest sublane-aligned start; optionally guarantee >= 2 row
    # blocks so both v7x TensorCores get work on the 'parallel' row axis.
    tr = min(max_tr, _round_up(256, sub))
    if min_row_blocks > 1 and R > sub:
        tr = min(tr, max(sub, _round_up(pl.cdiv(R, min_row_blocks), sub)))

    # Lane tile: fill the per-block byte budget.
    if L <= 128:
        tl = L
    else:
        tl = min(max_tl, max(128, _round_down(block_bytes // max(1, tr * itemsize), 128)))

    # If the lane extent capped the block, spend leftover budget on rows.
    if tl == max_tl and R > sub:
        want_tr = _round_down(block_bytes // max(1, tl * itemsize), sub)
        if min_row_blocks > 1:
            want_tr = min(want_tr, max(sub, _round_up(pl.cdiv(R, min_row_blocks), sub)))
        tr = min(max_tr, max(tr, want_tr))
    return tr, tl


# ---------------------------------------------------------------------------
# Kernels
# ---------------------------------------------------------------------------
def _make_stats_kernel(L, tl, mask_lanes):
    """Fused init reduction: per-row sum and sum-of-squares in one read of x."""

    def kernel(x_ref, sum_ref, ss_ref):
        @pl.when(pl.program_id(1) == 0)
        def _():
            sum_ref[...] = jnp.zeros_like(sum_ref)
            ss_ref[...] = jnp.zeros_like(ss_ref)

        x = x_ref[...].astype(jnp.float32)
        if mask_lanes:
            lane = lax.broadcasted_iota(jnp.int32, x.shape, 1)
            valid = (pl.program_id(1) * tl + lane) < L
            x = jnp.where(valid, x, 0.0)
        sum_ref[...] += jnp.sum(x, axis=1, keepdims=True)
        ss_ref[...] += jnp.sum(x * x, axis=1, keepdims=True)

    return kernel


def _scale_kernel(x_ref, b_ref, s_ref, o_ref):
    """output = (x + b) * s   (b, s precomputed per row, f32)."""
    o_ref[...] = ((x_ref[...] + b_ref[...]) * s_ref[...]).astype(o_ref.dtype)


def _bias_kernel(x_ref, b_ref, o_ref):
    """learn_scale=False path: output = x + b."""
    o_ref[...] = (x_ref[...] + b_ref[...]).astype(o_ref.dtype)


# ---------------------------------------------------------------------------
# Pallas wrappers
# ---------------------------------------------------------------------------
def _row_stats(x_rows, tr, tl):
    R, L = x_rows.shape
    mask_lanes = (L % tl) != 0
    kernel = _make_stats_kernel(L, tl, mask_lanes)
    return pl.pallas_call(
        kernel,
        out_shape=(
            jax.ShapeDtypeStruct((R, 1), jnp.float32),
            jax.ShapeDtypeStruct((R, 1), jnp.float32),
        ),
        grid=(pl.cdiv(R, tr), pl.cdiv(L, tl)),
        in_specs=[pl.BlockSpec((tr, tl), lambda r, l: (r, l))],
        out_specs=(
            pl.BlockSpec((tr, 1), lambda r, l: (r, 0)),
            pl.BlockSpec((tr, 1), lambda r, l: (r, 0)),
        ),
        compiler_params=_compiler_params(("parallel", "arbitrary")),
    )(x_rows)


def actnorm_apply(x_rows, b_rows, s_rows, tr, tl):
    R, L = x_rows.shape
    return pl.pallas_call(
        _scale_kernel,
        out_shape=jax.ShapeDtypeStruct((R, L), x_rows.dtype),
        grid=(pl.cdiv(R, tr), pl.cdiv(L, tl)),
        in_specs=[
            pl.BlockSpec((tr, tl), lambda r, l: (r, l)),
            pl.BlockSpec((tr, 1), lambda r, l: (r, 0)),
            pl.BlockSpec((tr, 1), lambda r, l: (r, 0)),
        ],
        out_specs=pl.BlockSpec((tr, tl), lambda r, l: (r, l)),
        compiler_params=_compiler_params(("parallel", "parallel")),
    )(x_rows, b_rows, s_rows)


def actnorm_bias_only(x_rows, b_rows, tr, tl):
    R, L = x_rows.shape
    return pl.pallas_call(
        _bias_kernel,
        out_shape=jax.ShapeDtypeStruct((R, L), x_rows.dtype),
        grid=(pl.cdiv(R, tr), pl.cdiv(L, tl)),
        in_specs=[
            pl.BlockSpec((tr, tl), lambda r, l: (r, l)),
            pl.BlockSpec((tr, 1), lambda r, l: (r, 0)),
        ],
        out_specs=pl.BlockSpec((tr, tl), lambda r, l: (r, l)),
        compiler_params=_compiler_params(("parallel", "parallel")),
    )(x_rows, b_rows)


# ---------------------------------------------------------------------------
# Module-like wrapper (stateful data-dependent init, like the PyTorch module)
# ---------------------------------------------------------------------------
class ActNorm:
    """ActNorm with data-dependent init (forward pass only).

    The Python-side `initialized` flag / parameter mutation mirrors the PyTorch
    module and is intended for eager use (not jit/vmap-safe).
    """

    def __init__(self, num_features, logscale_factor=1.0, scale=1.0, learn_scale=True):
        self.initialized = False
        self.num_features = num_features
        self.learn_scale = learn_scale
        self.logscale_factor = logscale_factor
        self.scale = scale
        # parameters are always float32 (matches PyTorch parameters)
        self.b = jnp.zeros((1, num_features, 1), jnp.float32)
        if learn_scale:
            self.logs = jnp.zeros((1, num_features, 1), jnp.float32)

    def __call__(self, x):
        input_shape = x.shape
        N, C = input_shape[0], input_shape[1]
        L = 1
        for d in input_shape[2:]:
            L *= d
        R = N * C
        # Native-layout view: (N, C, *spatial) -> (N*C, L).  Free (no transpose).
        x_rows = x.reshape(R, L)

        apply_block = _apply_block_bytes()
        tr_a, tl_a = _pick_tiles(R, L, x.dtype, apply_block)

        if not self.initialized:
            self.initialized = True
            M = N * L
            # Single fused pass over x: per-row sum + sum of squares (f32 acc).
            tr_r, tl_r = _pick_tiles(
                R, L, x.dtype, min(apply_block, _REDUCE_BLOCK_BYTES), min_row_blocks=2
            )
            row_sum, row_ss = _row_stats(x_rows, tr_r, tl_r)       # (R, 1) f32 each
            ch_sum = jnp.sum(row_sum.reshape(N, C), axis=0)        # (C,)
            mean_c = (ch_sum / M).astype(jnp.float32)
            b_c = (-mean_c).reshape(C, 1)                          # (C, 1)
            self.b = b_c.reshape(1, C, 1)
            if self.learn_scale:
                ch_ss = jnp.sum(row_ss.reshape(N, C), axis=0)      # (C,)
                # var = E[x^2] - mean^2, f32 accumulation, clamped at 0.
                var_c = jnp.maximum(ch_ss / M - mean_c * mean_c, 0.0).reshape(C, 1)
                logs_c = (
                    jnp.log(self.scale / (jnp.sqrt(var_c) + 1e-6))
                    / self.logscale_factor
                )
                self.logs = logs_c.astype(jnp.float32).reshape(1, C, 1)
            # TODO(synk): first-call path could fuse the apply into the stats
            # pass to save one more HBM read of x; kept separate for clarity.

        # Tiny host-side per-channel -> per-row expansion (O(N*C) elements).
        b_rows = jnp.tile(self.b.reshape(C, 1), (N, 1))            # (R, 1) f32
        if self.learn_scale:
            s_c = (
                jnp.exp(self.logs.reshape(C, 1) * self.logscale_factor)
                + _SCALING_MIN
            )
            s_rows = jnp.tile(s_c, (N, 1))                         # (R, 1) f32
            out_rows = actnorm_apply(x_rows, b_rows, s_rows, tr_a, tl_a)
        else:
            out_rows = actnorm_bias_only(x_rows, b_rows, tr_a, tl_a)

        return out_rows.reshape(input_shape)


# ---------------------------------------------------------------------------
# Pure-JAX reference (for verification)
# ---------------------------------------------------------------------------
def actnorm_ref(x, scale=1.0, logscale_factor=1.0, learn_scale=True):
    shp = x.shape
    N, C = shp[0], shp[1]
    xf = x.reshape(N, C, -1)
    sum_size = xf.shape[0] * xf.shape[-1]
    b = -jnp.sum(xf, axis=(0, -1)) / sum_size
    b = b[None, :, None]
    out = xf + b
    if learn_scale:
        var = jnp.sum((xf + b) ** 2, axis=(0, -1)) / sum_size
        var = var[None, :, None]
        logs = jnp.log(scale / (jnp.sqrt(var) + 1e-6)) / logscale_factor
        s = jnp.exp(logs * logscale_factor) + _SCALING_MIN
        out = out * s
    return out.reshape(shp)


if __name__ == "__main__":
    key = jax.random.PRNGKey(0)
    x = jax.random.normal(key, (2, 4, 16, 16), dtype=jnp.float32)

    # learn_scale=True: first call does data-dependent init + apply
    layer = ActNorm(num_features=4, logscale_factor=1.0, scale=1.0, learn_scale=True)
    out = jax.block_until_ready(layer(x))
    ref = actnorm_ref(x)
    assert out.shape == x.shape and out.dtype == x.dtype
    assert jnp.allclose(out, ref, atol=1e-5, rtol=1e-5), "mismatch vs reference"

    # second call reuses the initialized parameters (no re-init)
    out2 = jax.block_until_ready(layer(x))
    assert jnp.allclose(out2, ref, atol=1e-5, rtol=1e-5)

    # learn_scale=False path
    layer_b = ActNorm(num_features=4, learn_scale=False)
    out3 = jax.block_until_ready(layer_b(x))
    ref3 = actnorm_ref(x, learn_scale=False)
    assert jnp.allclose(out3, ref3, atol=1e-5, rtol=1e-5)

    # non-128-multiple spatial extent: exercises cdiv grids + masked reduction
    x2 = jax.random.normal(jax.random.PRNGKey(1), (2, 4, 12, 12), dtype=jnp.float32)
    layer2 = ActNorm(num_features=4, learn_scale=True)
    out4 = jax.block_until_ready(layer2(x2))
    ref4 = actnorm_ref(x2)
    assert jnp.allclose(out4, ref4, atol=1e-5, rtol=1e-5), "mismatch (ragged shape)"

    print("KERNEL_OK")
</pallas_src>

<mosaic_0001>
module attributes {stable_mosaic.version = 11 : i64} {
  func.func @kernel(%arg0: i32, %arg1: i32, %arg2: memref<8x256xf32, #tpu.memory_space<vmem>>, %arg3: memref<8x1xf32, #tpu.memory_space<vmem>>, %arg4: memref<8x1xf32, #tpu.memory_space<vmem>>) attributes {dimension_semantics = [#tpu.dimension_semantics<parallel>, #tpu.dimension_semantics<arbitrary>], iteration_bounds = array<i64: 1, 1>, scalar_prefetch = 0 : i64, scratch_operands = 0 : i64, tpu.core_type = #tpu.core_type<tc>, window_params = [{transform_indices = @transform_0, window_bounds = array<i64: 8, 256>}, {transform_indices = @transform_1, window_bounds = array<i64: 8, 1>}, {transform_indices = @transform_2, window_bounds = array<i64: 8, 1>}]} {
    %c0_i32 = arith.constant 0 : i32
    %0 = arith.cmpi eq, %arg1, %c0_i32 : i32
    %1 = arith.extui %0 : i1 to i32
    %c0_i32_0 = arith.constant 0 : i32
    %2 = arith.cmpi ne, %1, %c0_i32_0 : i32
    scf.if %2 {
      %cst_11 = arith.constant 0.000000e+00 : f32
      %15 = vector.broadcast %cst_11 : f32 to vector<8x1xf32>
      %c0_12 = arith.constant 0 : index
      %c0_13 = arith.constant 0 : index
      %16 = vector.load %arg3[%c0_12, %c0_13] : memref<8x1xf32, #tpu.memory_space<vmem>>, vector<8x1xf32>
      tpu.vector_store %arg3[%c0_12, %c0_13], %15 {strides = array<i32>} : memref<8x1xf32, #tpu.memory_space<vmem>>, vector<8x1xf32>,
      %cst_14 = arith.constant 0.000000e+00 : f32
      %17 = vector.broadcast %cst_14 : f32 to vector<8x1xf32>
      %c0_15 = arith.constant 0 : index
      %c0_16 = arith.constant 0 : index
      %18 = vector.load %arg4[%c0_15, %c0_16] : memref<8x1xf32, #tpu.memory_space<vmem>>, vector<8x1xf32>
      tpu.vector_store %arg4[%c0_15, %c0_16], %17 {strides = array<i32>} : memref<8x1xf32, #tpu.memory_space<vmem>>, vector<8x1xf32>,
    } else {
    }
    %c0 = arith.constant 0 : index
    %c0_1 = arith.constant 0 : index
    %3 = vector.load %arg2[%c0, %c0_1] : memref<8x256xf32, #tpu.memory_space<vmem>>, vector<8x256xf32>
    %c0_2 = arith.constant 0 : index
    %c0_3 = arith.constant 0 : index
    %4 = vector.load %arg3[%c0_2, %c0_3] : memref<8x1xf32, #tpu.memory_space<vmem>>, vector<8x1xf32>
    %cst = arith.constant dense<0.000000e+00> : vector<8xf32>
    %5 = vector.multi_reduction <add>, %3, %cst [1] : vector<8x256xf32> to vector<8xf32>
    %6 = vector.shape_cast %5 : vector<8xf32> to vector<8x1xf32>
    %7 = arith.addf %4, %6 : vector<8x1xf32>
    %c0_4 = arith.constant 0 : index
    %c0_5 = arith.constant 0 : index
    %8 = vector.load %arg3[%c0_4, %c0_5] : memref<8x1xf32, #tpu.memory_space<vmem>>, vector<8x1xf32>
    tpu.vector_store %arg3[%c0_4, %c0_5], %7 {strides = array<i32>} : memref<8x1xf32, #tpu.memory_space<vmem>>, vector<8x1xf32>,
    %c0_6 = arith.constant 0 : index
    %c0_7 = arith.constant 0 : index
    %9 = vector.load %arg4[%c0_6, %c0_7] : memref<8x1xf32, #tpu.memory_space<vmem>>, vector<8x1xf32>
    %10 = arith.mulf %3, %3 : vector<8x256xf32>
    %cst_8 = arith.constant dense<0.000000e+00> : vector<8xf32>
    %11 = vector.multi_reduction <add>, %10, %cst_8 [1] : vector<8x256xf32> to vector<8xf32>
    %12 = vector.shape_cast %11 : vector<8xf32> to vector<8x1xf32>
    %13 = arith.addf %9, %12 : vector<8x1xf32>
    %c0_9 = arith.constant 0 : index
    %c0_10 = arith.constant 0 : index
    %14 = vector.load %arg4[%c0_9, %c0_10] : memref<8x1xf32, #tpu.memory_space<vmem>>, vector<8x1xf32>
    tpu.vector_store %arg4[%c0_9, %c0_10], %13 {strides = array<i32>} : memref<8x1xf32, #tpu.memory_space<vmem>>, vector<8x1xf32>,
    return
  }
  func.func @transform_0(%arg0: i32, %arg1: i32) -> (i32, i32) {
    %c0_i32 = arith.constant 0 : i32
    return %arg0, %arg1 : i32, i32
  }
  func.func @transform_1(%arg0: i32, %arg1: i32) -> (i32, i32) {
    %c0_i32 = arith.constant 0 : i32
    %c0_i32_0 = arith.constant 0 : i32
    return %arg0, %c0_i32 : i32, i32
  }
  func.func @transform_2(%arg0: i32, %arg1: i32) -> (i32, i32) {
    %c0_i32 = arith.constant 0 : i32
    %c0_i32_0 = arith.constant 0 : i32
    return %arg0, %c0_i32 : i32, i32
  }
}

</mosaic_0001>

<bundles_post_ra>
// kernel: tpu_custom_call.1
= control target key start
LH: loop header
LB: loop body
LE: loop exit
PB: predicated region body
PF: predicated region fallthrough
CT: control target
= control target key end

     0   :  { %8 = vsyncpa [#allocation3], 0  ;;  %s81_s9 = smov [#allocation2]   ;;  %s132_s0 = inlined_call_operand.hbm [shape: f32[8,256], index: 0, kind: input, shape index: {}]   ;;  %s133_s1 = inlined_call_operand.vmem [shape: f32[8,1], index: 1, kind: output, shape index: {0}]   ;;  %s134_s2 = inlined_call_operand.vmem [shape: f32[8,1], index: 2, kind: output, shape index: {1}]  }
   0x1   :  { %s15_s10 = sshll.u32 %s81_s9, 4  ;;  %s57_s13 = scalar_lea.hbm %s132_s0, 256  ;;  %s16_s10 = int_to_ptr.vmem [resolvable:$true] %s15_s10 }
   0x2   :  { %p58_p0 = scmp.ne.s32.totalorder %s132_s0, %s57_s13  ;;  %p61_p1 = scmp.lt.u32.totalorder %s57_s13, %s132_s0 }
   0x4   :  { %p63_p2 = pnand %p61_p1, %p58_p0 }
   0x6   :  { %66 = shalt.err (!%p63_p2)
}
   0x7   :  { %s67_s18 = scalar_lea.vmem %s16_s10, 256  ;;  %p72_p4 = scmp.lt.s32.totalorder %s16_s10, %s16_s10 }
   0x8   :  { %p68_p3 = scmp.ne.s32.totalorder %s16_s10, %s67_s18  ;;  %p73_p5 = scmp.lt.s32.totalorder %s67_s18, %s67_s18 }
   0xa   :  { %p74_p6 = por %p73_p5, %p72_p4 }
   0xc   :  { %p75_p7 = pnand %p74_p6, %p68_p3 }
   0xe   :  { %78 = shalt.err (!%p75_p7)
}
   0xf   :  { %18 = dma.hbm_to_vmem [thread:$0]  %s132_s0, 256, %s16_s10, [#allocation3]  }
  0x10   :  { %79 = dma.done.wait [#allocation3], 256  }
  0x11   :  { %80 = vsyncadd [#allocation3], 4294967040  ;;  %vm26_vm0 = vcmask 7168   ;;  %v82_v0 = vmov 0.0   ;;  %v29_v1 = vld [vmem:[#allocation2] sm:$0xff]  ;;  %v30_v2 = vld [vmem:[#allocation2 + $0x8] sm:$0xff] }
  0x12   :  { %27 = vst.msk [vmem:[%s133_s1] sm:$0xff] %vm26_vm0, %v82_v0  ;;  %28 = vst.msk [vmem:[%s134_s2] sm:$0xff] %vm26_vm0, %v82_v0  ;;  %v32_v3 = vadd.f32 %v30_v2, %v29_v1  ;;  %v39_v4 = vmul.f32 %v29_v1, %v29_v1  ;;  %v40_v5 = vmul.f32 %v30_v2, %v30_v2 }
  0x14   :  { %33 = vadd.xlane.f32.xlu0 %v32_v3  ;;  %v41_v6 = vadd.f32 %v40_v5, %v39_v4 }
  0x18   :  { %42 = vadd.xlane.f32.xlu0 %v41_v6 }
  0x19   :  { %v31_v7 = vld [vmem:[%s133_s1] sm:$0xff] }
  0x1a   :  { %v38_v10 = vld [vmem:[%s134_s2] sm:$0xff] }
  0xa1   :  { %v34_v8 = vpop.xlane.xlu0 %33 }
  0xa2   :  { %v35_v9 = vadd.f32 %v34_v8, %v31_v7 }
  0xa4   :  { %37 = vst.msk [vmem:[%s133_s1] sm:$0xff] %vm26_vm0, %v35_v9 }
  0xa5   :  { %v43_v11 = vpop.xlane.xlu0 %42 }
  0xa6   :  { %v44_v12 = vadd.f32 %v43_v11, %v38_v10 }
  0xa8   :  { %45 = vst.msk [vmem:[%s134_s2] sm:$0xff] %vm26_vm0, %v44_v12 }
  0xa9   :  { %54 = vsyncpa [#allocation3], 1 }

</bundles_post_ra>
